<compile_context>
chip_gen: v6e
topology: v6e:2x2x1
jax: 0.10.0
libtpu: 0.0.40
codegen_flags: <defaults>
</compile_context>

<pallas_src>
import functools
import math

import jax
import jax.numpy as jnp
from jax.experimental import pallas as pl
from jax.experimental.pallas import tpu as pltpu


# ----------------------------------------------------------------------------
# Fused matmul + bias + (optional) sigmoid Pallas kernel
# ----------------------------------------------------------------------------
def _fused_matmul_kernel(x_ref, w_ref, b_ref, o_ref, *, apply_sigmoid):
    # MXU matmul: bf16 operands, f32 accumulation.
    acc = jnp.dot(
        x_ref[...].astype(jnp.bfloat16),
        w_ref[...].astype(jnp.bfloat16),
        preferred_element_type=jnp.float32,
    )
    acc = acc + b_ref[...]  # (1, Np) broadcast over (tile_m, Np)
    if apply_sigmoid:
        acc = 1.0 / (1.0 + jnp.exp(-acc))  # sigmoid on VPU/EUP, fused
    o_ref[...] = acc.astype(o_ref.dtype)


def _round_up(v, m):
    return (v + m - 1) // m * m


def matmul_bias_act(x, w, b, *, sigmoid, tile_m_max=256):
    """out = act(x @ w + b) with x:(M,K), w:(K,N), b:(N,).  Pallas/MXU."""
    M, K = x.shape
    K2, N = w.shape
    assert K == K2

    Kp = _round_up(K, 128)
    Np = _round_up(N, 128)
    tile_m = min(tile_m_max, _round_up(M, 8))
    Mp = _round_up(M, tile_m)

    # Zero-pad operands to MXU-friendly shapes (padding contributes zeros).
    xp = jnp.zeros((Mp, Kp), x.dtype).at[:M, :K].set(x)
    wp = jnp.zeros((Kp, Np), w.dtype).at[:K, :N].set(w)
    bp = jnp.zeros((1, Np), b.dtype).at[0, :N].set(b)

    grid = (Mp // tile_m,)
    bytes_accessed = 4 * (Mp * Kp + Kp * Np + Np + Mp * Np)

    out = pl.pallas_call(
        functools.partial(_fused_matmul_kernel, apply_sigmoid=sigmoid),
        out_shape=jax.ShapeDtypeStruct((Mp, Np), x.dtype),
        grid_spec=pltpu.PrefetchScalarGridSpec(
            num_scalar_prefetch=0,
            grid=grid,
            in_specs=[
                pl.BlockSpec((tile_m, Kp), lambda i: (i, 0)),
                pl.BlockSpec((Kp, Np), lambda i: (0, 0)),
                pl.BlockSpec((1, Np), lambda i: (0, 0)),
            ],
            out_specs=pl.BlockSpec((tile_m, Np), lambda i: (i, 0)),
        ),
        compiler_params=pltpu.CompilerParams(
            dimension_semantics=("parallel",),  # shard M over v7x's 2 TCs
        ),
        cost_estimate=pl.CostEstimate(
            flops=2 * Mp * Kp * Np,
            transcendentals=Mp * Np if sigmoid else 0,
            bytes_accessed=bytes_accessed,
        ),
    )(xp, wp, bp)

    return out[:M, :N]


# ----------------------------------------------------------------------------
# Conv layer = im2col (wrapper glue) + fused Pallas matmul
# ----------------------------------------------------------------------------
def _im2col(x, ksize, stride, padding):
    """x: (B, C, H, W) -> patches (B*Ho*Wo, C*k*k), K ordered (C, kh, kw)."""
    B, C, H, W = x.shape
    Ho = (H + 2 * padding - ksize) // stride + 1
    Wo = (W + 2 * padding - ksize) // stride + 1
    xp = jnp.pad(x, ((0, 0), (0, 0), (padding, padding), (padding, padding)))
    taps = []
    for dh in range(ksize):
        for dw in range(ksize):
            taps.append(
                xp[:, :, dh:dh + stride * Ho:stride, dw:dw + stride * Wo:stride]
            )  # (B, C, Ho, Wo)
    stacked = jnp.stack(taps, axis=-1)              # (B, C, Ho, Wo, k*k)
    patches = jnp.transpose(stacked, (0, 2, 3, 1, 4))  # (B, Ho, Wo, C, k*k)
    return patches.reshape(B * Ho * Wo, C * ksize * ksize), Ho, Wo


def conv2d_sigmoid(x, w, b, *, stride, padding):
    """x: NCHW, w: (C_out, C_in, k, k) -> NCHW, sigmoid fused in the kernel."""
    B, C, H, W = x.shape
    C_out, C_in, k, _ = w.shape
    assert C == C_in
    patches, Ho, Wo = _im2col(x, k, stride, padding)
    w_mat = jnp.transpose(w, (1, 2, 3, 0)).reshape(C_in * k * k, C_out)
    out = matmul_bias_act(patches, w_mat, b, sigmoid=True)  # (B*Ho*Wo, C_out)
    return out.reshape(B, Ho, Wo, C_out).transpose(0, 3, 1, 2)


# ----------------------------------------------------------------------------
# LeNet forward
# ----------------------------------------------------------------------------
def lenet_forward(params, x):
    h = conv2d_sigmoid(x, params["conv1_w"], params["conv1_b"], stride=2, padding=2)
    h = conv2d_sigmoid(h, params["conv2_w"], params["conv2_b"], stride=2, padding=2)
    h = conv2d_sigmoid(h, params["conv3_w"], params["conv3_b"], stride=1, padding=2)
    # out.view(B, -1): contiguous NCHW flatten — free metadata reshape.
    flat = h.reshape(h.shape[0], -1)                       # (B, 768)
    # Linear(768, 100): y = x @ W^T + b, fused Pallas matmul (no activation).
    return matmul_bias_act(flat, params["fc_w"].T, params["fc_b"], sigmoid=False)


# ----------------------------------------------------------------------------
# Pure-JAX reference (for correctness check)
# ----------------------------------------------------------------------------
def lenet_reference(params, x):
    def conv(x, w, b, stride, padding):
        y = jax.lax.conv_general_dilated(
            x, w,
            window_strides=(stride, stride),
            padding=((padding, padding), (padding, padding)),
            dimension_numbers=("NCHW", "OIHW", "NCHW"),
            precision=jax.lax.Precision.HIGHEST,
        )
        return jax.nn.sigmoid(y + b[None, :, None, None])

    h = conv(x, params["conv1_w"], params["conv1_b"], 2, 2)
    h = conv(h, params["conv2_w"], params["conv2_b"], 2, 2)
    h = conv(h, params["conv3_w"], params["conv3_b"], 1, 2)
    flat = h.reshape(h.shape[0], -1)
    return (
        jnp.dot(flat, params["fc_w"].T, precision=jax.lax.Precision.HIGHEST)
        + params["fc_b"]
    )


if __name__ == "__main__":
    key = jax.random.PRNGKey(0)
    ks = jax.random.split(key, 9)

    def init_conv(k, c_out, c_in, ksz):
        fan_in = c_in * ksz * ksz
        return (jax.random.normal(k, (c_out, c_in, ksz, ksz), jnp.float32)
                / math.sqrt(fan_in))

    params = {
        "conv1_w": init_conv(ks[0], 12, 3, 5),
        "conv1_b": jax.random.normal(ks[1], (12,), jnp.float32) * 0.1,
        "conv2_w": init_conv(ks[2], 12, 12, 5),
        "conv2_b": jax.random.normal(ks[3], (12,), jnp.float32) * 0.1,
        "conv3_w": init_conv(ks[4], 12, 12, 5),
        "conv3_b": jax.random.normal(ks[5], (12,), jnp.float32) * 0.1,
        "fc_w": jax.random.normal(ks[6], (100, 768), jnp.float32) / math.sqrt(768.0),
        "fc_b": jax.random.normal(ks[7], (100,), jnp.float32) * 0.1,
    }

    # Input consistent with Linear(768): 12 * 8 * 8 = 768  =>  32x32 RGB.
    x = jax.random.normal(ks[8], (2, 3, 32, 32), dtype=jnp.float32)

    y = jax.block_until_ready(lenet_forward(params, x))
    ref = lenet_reference(params, x)

    assert y.shape == (2, 100), y.shape
    assert y.dtype == jnp.float32
    # bf16 MXU operands vs f32 reference -> allow a small numeric tolerance.
    max_err = float(jnp.max(jnp.abs(y - ref)))
    assert max_err < 5e-2, f"max abs error {max_err}"

    print("KERNEL_OK")
</pallas_src>

<mosaic_0001>
module attributes {stable_mosaic.version = 11 : i64} {
  func.func @_fused_matmul_kernel(%arg0: i32, %arg1: memref<256x128xf32, #tpu.memory_space<vmem>>, %arg2: memref<128x128xf32, #tpu.memory_space<vmem>>, %arg3: memref<1x128xf32, #tpu.memory_space<vmem>>, %arg4: memref<256x128xf32, #tpu.memory_space<vmem>>) attributes {dimension_semantics = [#tpu.dimension_semantics<parallel>], iteration_bounds = array<i64: 2>, scalar_prefetch = 0 : i64, scratch_operands = 0 : i64, tpu.core_type = #tpu.core_type<tc>, window_params = [{transform_indices = @transform_0, window_bounds = array<i64: 256, 128>}, {pipeline_mode = #tpu.pipeline_mode<synchronous>, transform_indices = @transform_1, window_bounds = array<i64: 128, 128>}, {pipeline_mode = #tpu.pipeline_mode<synchronous>, transform_indices = @transform_2, window_bounds = array<i64: 1, 128>}, {transform_indices = @transform_3, window_bounds = array<i64: 256, 128>}]} {
    %c0 = arith.constant 0 : index
    %c0_0 = arith.constant 0 : index
    %0 = vector.load %arg1[%c0, %c0_0] : memref<256x128xf32, #tpu.memory_space<vmem>>, vector<256x128xf32>
    %1 = arith.truncf %0 : vector<256x128xf32> to vector<256x128xbf16>
    %c0_1 = arith.constant 0 : index
    %c0_2 = arith.constant 0 : index
    %2 = vector.load %arg2[%c0_1, %c0_2] : memref<128x128xf32, #tpu.memory_space<vmem>>, vector<128x128xf32>
    %3 = arith.truncf %2 : vector<128x128xf32> to vector<128x128xbf16>
    %cst = arith.constant dense<0.000000e+00> : vector<256x128xf32>
    %4 = tpu.matmul %1, %3, %cst {dimension_numbers = #tpu.dot_dimension_numbers<[1], [0], [0], [1], [0, 0, 1, 1], [], []>} : vector<256x128xbf16>, vector<128x128xbf16>, vector<256x128xf32> -> vector<256x128xf32>
    %c0_3 = arith.constant 0 : index
    %c0_4 = arith.constant 0 : index
    %5 = vector.load %arg3[%c0_3, %c0_4] : memref<1x128xf32, #tpu.memory_space<vmem>>, vector<1x128xf32>
    %6 = vector.broadcast %5 : vector<1x128xf32> to vector<256x128xf32>
    %7 = arith.addf %4, %6 : vector<256x128xf32>
    %cst_5 = arith.constant 0.000000e+00 : f32
    %8 = vector.broadcast %cst_5 : f32 to vector<256x128xf32>
    %9 = arith.subf %8, %7 : vector<256x128xf32>
    %10 = math.exp %9 : vector<256x128xf32>
    %cst_6 = arith.constant 1.000000e+00 : f32
    %11 = vector.broadcast %cst_6 : f32 to vector<256x128xf32>
    %12 = arith.addf %11, %10 : vector<256x128xf32>
    %cst_7 = arith.constant 1.000000e+00 : f32
    %13 = vector.broadcast %cst_7 : f32 to vector<256x128xf32>
    %14 = arith.divf %13, %12 : vector<256x128xf32>
    %c0_8 = arith.constant 0 : index
    %c0_9 = arith.constant 0 : index
    %15 = vector.load %arg4[%c0_8, %c0_9] : memref<256x128xf32, #tpu.memory_space<vmem>>, vector<256x128xf32>
    tpu.vector_store %arg4[%c0_8, %c0_9], %14 {strides = array<i32>} : memref<256x128xf32, #tpu.memory_space<vmem>>, vector<256x128xf32>,
    return
  }
  func.func @transform_0(%arg0: i32) -> (i32, i32) {
    %c0_i32 = arith.constant 0 : i32
    %c0_i32_0 = arith.constant 0 : i32
    return %arg0, %c0_i32 : i32, i32
  }
  func.func @transform_1(%arg0: i32) -> (i32, i32) {
    %c0_i32 = arith.constant 0 : i32
    %c0_i32_0 = arith.constant 0 : i32
    %c0_i32_1 = arith.constant 0 : i32
    return %c0_i32, %c0_i32_0 : i32, i32
  }
  func.func @transform_2(%arg0: i32) -> (i32, i32) {
    %c0_i32 = arith.constant 0 : i32
    %c0_i32_0 = arith.constant 0 : i32
    %c0_i32_1 = arith.constant 0 : i32
    return %c0_i32, %c0_i32_0 : i32, i32
  }
  func.func @transform_3(%arg0: i32) -> (i32, i32) {
    %c0_i32 = arith.constant 0 : i32
    %c0_i32_0 = arith.constant 0 : i32
    return %arg0, %c0_i32 : i32, i32
  }
}

</mosaic_0001>

<bundles_post_ra>
// kernel: tpu_custom_call.1
= control target key start
LH: loop header
LB: loop body
LE: loop exit
PB: predicated region body
PF: predicated region fallthrough
CT: control target
= control target key end

     0   :  { %8 = vsyncpa [#allocation3], 0  ;;  %s1508_s0 = inlined_call_operand.hbm [shape: f32[512,128], index: 0, kind: input, shape index: {}]   ;;  %s1509_s1 = inlined_call_operand.hbm [shape: f32[128,128], index: 1, kind: input, shape index: {}]   ;;  %s1510_s2 = inlined_call_operand.vmem [shape: f32[1,128], index: 2, kind: input, shape index: {}]   ;;  %s1511_s3 = inlined_call_operand.hbm [shape: f32[512,128], index: 3, kind: output, shape index: {}]  }
   0x1   :  { %10 = vsyncpa [#allocation3 + $0x1], 0 }
   0x2   :  { %11 = vsyncpa [#allocation6], 0 }
   0x3   :  { %12 = vsyncpa [#allocation4], 0 }
   0x4   :  { %14 = vsyncpa [#allocation4 + $0x1], 0  ;;  %s1215_s12 = smov 0   ;;  %s1217_s13 = smov 0  }
   0x5   :  { %s1219_s14 = smov 0   ;;  %s1221_s15 = smov 0  }
   0x6 LB: > { %s1236_s16 = sadd.s32 4294967295, %s1186_s15   ;;  %s768_s17 = sadd.s32 4294967294, %s1186_s15   ;;  %s1186_s15 = sphi %s1221_s15, %s1533_s15   ;;  %s1182_s14 = sphi %s1219_s14, %s1532_s14   ;;  %s1178_s13 = sphi %s1217_s13, %s1531_s13   ;;  %s1174_s12 = sphi %s1215_s12, %s1530_s12  }
   0x7   : > { %p40_p0 = scmp.ne.s32.totalorder %s1178_s13, %s1174_s12  ;;  %p1512_p1 = scmp.eq.s32.totalorder %s1236_s16, 0 }
   0x8   : > { %p112_p3 = scmp.eq.s32.totalorder %s768_s17, 1  ;;  %p769_p5 = scmp.ge.s32.totalorder %s1186_s15, 1 }
   0x9   : > { %p1245_p4 = por %p1512_p1, %p40_p0  ;;  %p119_p7 = scmp.lt.s32.totalorder %s1186_s15, 3 }
   0xa   : > { %p1250_p6 = por %p112_p3, %p40_p0  ;;  %s1188_s21 = smov [#allocation5]  }
   0xb   : > { %s1516_s18 = scalar_select %p1245_p4, 1, 0 }
   0xc   : > { %s1517_s19 = scalar_select %p1250_p6, 1, 0 }
   0xd   : > { %p1255_p8 = pnand %p769_p5, %p119_p7  ;;  %s131_s22 = sshll.u32 %s1188_s21, 4  ;;  %s132_s22 = int_to_ptr.vmem [resolvable:$true] %s131_s22 }
   0xe   : > { %s1269_s24 = sadd.s32 1, %s1186_s15   ;;  %s27_s25 = sadd.s32 1, %s1182_s14 }
   0xf   : > { %s1518_s20 = scalar_select %p1255_p8, 1, 0 }
  0x10   : > { %p883_p9 = pneg %p1255_p8  ;;  %s24_s26 = ssub.s32 %s1186_s15, %s1269_s24 }
  0x11   : > { %s1075_s27 = scalar_lea.vmem %s132_s22, 2048  ;;  %p1083_p5 = scmp.lt.s32.totalorder %s132_s22, %s132_s22 }
  0x12   : > { %p1264_p11 = pnand %p883_p9, %p1512_p1  ;;  %p1076_p13 = scmp.ne.s32.totalorder %s132_s22, %s1075_s27 }
  0x13   : > { %p1084_p7 = scmp.lt.s32.totalorder %s1075_s27, %s1075_s27 }
  0x14   : > { %p1066_p12 = pneg %p1264_p11 }
  0x15   : > { %p1085_p10 = por %p1084_p7, %p1083_p5 }
  0x16   : > { %p1078_p0 = pnand %p1076_p13, %p1066_p12 }
  0x18   : > { %p1079_p3 = pneg %p1078_p0 }
  0x1a   : > { %p1086_p2 = pnand %p1085_p10, %p1079_p3 }
  0x1c   : > { %1089 = shalt.err (!%p1086_p2)
}
  0x1d   : > { %s1189_s28 = smov 128   ;;  %s1190_s29 = smov 8  }
  0x1e   : > { %886 = dma.hbm_to_vmem [thread:$0]  (!%p1264_p11), %s1509_s1, 2048, %s132_s22, [#allocation6], %s1189_s28, %s1189_s28, %s1190_s29  }
  0x1f   : > { %p25_p2 = scmp.eq.s32.totalorder %s24_s26, 0  ;;  %p34_p9 = scmp.ne.s32.totalorder %s1182_s14, %s1178_s13 }
  0x20   : > { %p35_p10 = scmp.eq.s32.totalorder %s1186_s15, 0  ;;  %p896_p12 = scmp.lt.s32.totalorder %s1186_s15, 2 }
  0x21   : > { %s1289_s5 = scalar_select %p25_p2, %s1182_s14, %s27_s25  }
  0x22   : > { %p36_p13 = por %p35_p10, %p34_p9  ;;  %p1520_p0 = scmp.eq.s32.totalorder %s1236_s16, 1 }
  0x23   : > { %s148_s7 = sand.u32 1, %s1182_s14   ;;  %s785_s8 = sshll.u32 %s1186_s15, 12 }
  0x24   : > { %p1293_p3 = por %p1520_p0, %p34_p9  ;;  %s772_s9 = sshll.u32 %s148_s7, 8 }
  0x25   : > { %s1302_s17 = scalar_lea.hbm %s1508_s0, %s785_s8  ;;  %s152_s21 = scalar_lea.vmem [#allocation2], %s772_s9 }
  0x26   : > { %s1521_s6 = scalar_select %p1293_p3, 1, 0 }
  0x27   : > { %s159_s22 = sshll.u32 %s152_s21, 4  ;;  %p1304_p11 = pnand %p896_p12, %p36_p13  ;;  %s1308_s22 = int_to_ptr.vmem [resolvable:$true] %s159_s22 }
  0x28   : > { %s1310_s25 = scalar_lea.sflag [#allocation3], %s148_s7  ;;  %s1090_s26 = scalar_lea.hbm %s1302_s17, 4096 }
  0x29   : > { %p1091_p5 = scmp.ne.s32.totalorder %s1302_s17, %s1090_s26  ;;  %p1092_p7 = pneg %p1304_p11 }
  0x2a   : > { %s1095_s4 = scalar_lea.hbm %s1508_s0, 8192  ;;  %p1096_p10 = scmp.lt.s32.totalorder %s1302_s17, %s1508_s0 }
  0x2b   : > { %p1093_p2 = pnand %p1092_p7, %p1091_p5  ;;  %p1097_p12 = scmp.lt.s32.totalorder %s1095_s4, %s1090_s26 }
  0x2d   : > { %p1094_p9 = pneg %p1093_p2  ;;  %p1098_p13 = por %p1097_p12, %p1096_p10 }
  0x2f   : > { %p1099_p0 = pnand %p1098_p13, %p1094_p9 }
  0x31   : > { %1102 = shalt.err (!%p1099_p0)
}
  0x32   : > { %s1103_s7 = scalar_lea.vmem %s1308_s22, 4096  ;;  %s1191_s10 = smov [#allocation2]  }
  0x33   : > { %p1104_p1 = scmp.ne.s32.totalorder %s1308_s22, %s1103_s7  ;;  %s1108_s11 = sshll.u32 %s1191_s10, 4  ;;  %s1109_s11 = int_to_ptr.vmem [resolvable:$false] %s1108_s11 }
  0x34   : > { %s1110_s21 = scalar_lea.vmem %s1109_s11, 8192  ;;  %p1111_p2 = scmp.lt.s32.totalorder %s1308_s22, %s1109_s11 }
  0x35   : > { %p1106_p6 = pnand %p1104_p1, %p1092_p7  ;;  %p1112_p3 = scmp.lt.s32.totalorder %s1110_s21, %s1103_s7 }
  0x37   : > { %p1107_p5 = pneg %p1106_p6  ;;  %p1113_p4 = por %p1112_p3, %p1111_p2 }
  0x39   : > { %p1114_p8 = pnand %p1113_p4, %p1107_p5 }
  0x3b   : > { %1117 = shalt.err (!%p1114_p8)
}
  0x3c   : > { %890 = dma.hbm_to_vmem [thread:$0]  (!%p1304_p11), %s1302_s17, 4096, %s1308_s22, %s1310_s25, %s1189_s28, %s1189_s28, %s1190_s29  }
  0x3d   : > { %p1523_p1 = scmp.ne.s32.totalorder %s1518_s20, 0 }
  0x3e   : > { %s1337_s26 = sand.u32 (!%p1523_p1), 1, %s1178_s13   ;;  %p1524_p4 = scmp.ne.s32.totalorder (!%p1523_p1), %s1516_s18, 0 }
  0x3f   : > { %171 = sbr.rel (%p1523_p1) target bundleno = 402 (0x192), region = 32  ;;  %s776_s27 = sshll.u32 (!%p1523_p1), %s1337_s26, 8 }
  0x40   : > { %s174_s30 = scalar_lea.sflag (!%p1523_p1), [#allocation3], %s1337_s26  ;;  %s1343_s23 = scalar_lea.vmem (!%p1523_p1), [#allocation2], %s776_s27 }
  0x44   : > { %1161 = dma.done.wait (%p1524_p4), %s174_s30, 4096  }
  0x45   : > { %1163 = vsyncadd (%p1524_p4), %s174_s30, 4294963200  ;;  %p1525_p6 = scmp.eq.s32.totalorder %s1236_s16, 0 }
  0x47   : > { %1165 = dma.done.wait (%p1525_p6), [#allocation6], 2048   ;;  %p1526_p8 = pmov %p1525_p6 }
  0x48   : > { %v269_v0 = vld [vmem:[#allocation5 + $0x70] sm:$0xff]  ;;  %v270_v1 = vld [vmem:[#allocation5 + $0x78] sm:$0xff]  ;;  %v267_v2 = vld [vmem:[#allocation5 + $0x60] sm:$0xff]  ;;  %s1417_s28 = scalar_lea.vmem [#allocation7], %s776_s27  ;;  %s786_s29 = sshll.u32 %s1236_s16, 12 }
  0x49   : > { %1167 = vsyncadd (%p1526_p8), [#allocation6], 4294965248  ;;  %v278_v3 = vpack.c.bf16 %v270_v1, %v269_v0  ;;  %v268_v4 = vld [vmem:[#allocation5 + $0x68] sm:$0xff]  ;;  %v265_v6 = vld [vmem:[#allocation5 + $0x50] sm:$0xff]  ;;  %s685_s17 = sshll.u32 %s1417_s28, 4  ;;  %s1462_s4 = scalar_lea.hbm %s1511_s3, %s786_s29  ;;  %s1464_s17 = int_to_ptr.vmem [resolvable:$true] %s685_s17 }
  0x4a   : > { %v277_v5 = vpack.c.bf16 %v268_v4, %v267_v2  ;;  %v266_v7 = vld [vmem:[#allocation5 + $0x58] sm:$0xff]  ;;  %v263_v9 = vld [vmem:[#allocation5 + $0x40] sm:$0xff]  ;;  %v208_v11 = vld [vmem:[%s1343_s23 + $0x8] sm:$0xff]  ;;  %s672_s8 = scalar_lea.sflag [#allocation4], %s1337_s26  ;;  %s1118_s9 = scalar_lea.vmem %s1464_s17, 4096 }
  0x4b   : > { %811 = vmatprep.subr.bf16.mxu0 %v278_v3  ;;  %859 = vmatprep.subr.bf16.mxu1 %v278_v3  ;;  %v276_v8 = vpack.c.bf16 %v266_v7, %v265_v6  ;;  %v207_v10 = vld [vmem:[%s1343_s23] sm:$0xff]  ;;  %v264_v12 = vld [vmem:[#allocation5 + $0x48] sm:$0xff]  ;;  %v261_v18 = vld [vmem:[#allocation5 + $0x30] sm:$0xff]  ;;  %p1119_p3 = scmp.ne.s32.totalorder %s1464_s17, %s1118_s9  ;;  %p1527_p11 = scmp.ne.s32.totalorder %s1521_s6, 0 }
  0x4c   : > { %812 = vmatpush3.bf16.msra.mxu0 %v278_v3  ;;  %867 = vmatpush3.bf16.msra.mxu1 %v278_v3  ;;  %v239_v13 = vpack.c.bf16 %v208_v11, %v207_v10  ;;  %v223_v14 = vld [vmem:[%s1343_s23 + $0x80] sm:$0xff]  ;;  %v224_v15 = vld [vmem:[%s1343_s23 + $0x88] sm:$0xff]  ;;  %v275_v17 = vpack.c.bf16 %v264_v12, %v263_v9  ;;  %v262_v19 = vld [vmem:[#allocation5 + $0x38] sm:$0xff]  ;;  %s1192_s16 = smov [#allocation7]  }
  0x4d   : > { %813 = vmatprep.subr.bf16.mxu0 %v277_v5  ;;  %860 = vmatprep.subr.bf16.mxu1 %v277_v5  ;;  %v247_v16 = vpack.c.bf16 %v224_v15, %v223_v14  ;;  %v274_v20 = vpack.c.bf16 %v262_v19, %v261_v18  ;;  %v259_v21 = vld [vmem:[#allocation5 + $0x20] sm:$0xff]  ;;  %v260_v22 = vld [vmem:[#allocation5 + $0x28] sm:$0xff]  ;;  %v257_v24 = vld [vmem:[#allocation5 + $0x10] sm:$0xff]  ;;  %p1120_p7 = pnand %p1119_p3, %p1527_p11  ;;  %s1122_s7 = sshll.u32 %s1192_s16, 4  ;;  %s1123_s7 = int_to_ptr.vmem [resolvable:$false] %s1122_s7 }
  0x4e   : > { %827 = vmatprep.mubr.bf16.mxu0 %v239_v13  ;;  %v273_v23 = vpack.c.bf16 %v260_v22, %v259_v21  ;;  %v258_v25 = vld [vmem:[#allocation5 + $0x18] sm:$0xff]  ;;  %v255_v27 = vld [vmem:[#allocation5] sm:$0xff]  ;;  %v256_v28 = vld [vmem:[#allocation5 + $0x8] sm:$0xff]  ;;  %s1124_s10 = scalar_lea.vmem %s1123_s7, 8192  ;;  %p1125_p10 = scmp.lt.s32.totalorder %s1464_s17, %s1123_s7 }
  0x4f   : > { %843 = vmatprep.mubr.bf16.mxu1 %v247_v16  ;;  %v272_v26 = vpack.c.bf16 %v258_v25, %v257_v24  ;;  %v271_v29 = vpack.c.bf16 %v256_v28, %v255_v27  ;;  %v209_v30 = vld [vmem:[%s1343_s23 + $0x10] sm:$0xff]  ;;  %v210_v31 = vld [vmem:[%s1343_s23 + $0x18] sm:$0xff]  ;;  %v211_v34 = vld [vmem:[%s1343_s23 + $0x20] sm:$0xff]  ;;  %p1121_p9 = pneg %p1120_p7  ;;  %p1126_p12 = scmp.lt.s32.totalorder %s1124_s10, %s1118_s9 }
  0x50   : > { %814 = vmatpush3.bf16.msra.mxu0 %v277_v5  ;;  %868 = vmatpush3.bf16.msra.mxu1 %v277_v5  ;;  %v225_v32 = vld [vmem:[%s1343_s23 + $0x90] sm:$0xff]  ;;  %v226_v33 = vld [vmem:[%s1343_s23 + $0x98] sm:$0xff]  ;;  %v212_v35 = vld [vmem:[%s1343_s23 + $0x28] sm:$0xff]  ;;  %v240_v38 = vpack.c.bf16 %v210_v31, %v209_v30 }
  0x51   : > { %815 = vmatprep.subr.bf16.mxu0 %v276_v8  ;;  %861 = vmatprep.subr.bf16.mxu1 %v276_v8  ;;  %v227_v36 = vld [vmem:[%s1343_s23 + $0xa0] sm:$0xff]  ;;  %v228_v37 = vld [vmem:[%s1343_s23 + $0xa8] sm:$0xff]  ;;  %v248_v39 = vpack.c.bf16 %v226_v33, %v225_v32  ;;  %v241_v40 = vpack.c.bf16 %v212_v35, %v211_v34  ;;  %v213_v42 = vld [vmem:[%s1343_s23 + $0x30] sm:$0xff]  ;;  %p1127_p13 = por %p1126_p12, %p1125_p10 }
  0x52   : > { %v249_v41 = vpack.c.bf16 %v228_v37, %v227_v36  ;;  %v214_v43 = vld [vmem:[%s1343_s23 + $0x38] sm:$0xff]  ;;  %v229_v44 = vld [vmem:[%s1343_s23 + $0xb0] sm:$0xff]  ;;  %v215_v46 = vld [vmem:[%s1343_s23 + $0x40] sm:$0xff] }
  0x53   : > { %v230_v45 = vld [vmem:[%s1343_s23 + $0xb8] sm:$0xff]  ;;  %v216_v47 = vld [vmem:[%s1343_s23 + $0x48] sm:$0xff]  ;;  %v231_v48 = vld [vmem:[%s1343_s23 + $0xc0] sm:$0xff]  ;;  %v242_v50 = vpack.c.bf16 %v214_v43, %v213_v42  ;;  %p1128_p0 = pnand %p1127_p13, %p1121_p9 }
  0x54   : > { %816 = vmatpush3.bf16.msra.mxu0 %v276_v8  ;;  %869 = vmatpush3.bf16.msra.mxu1 %v276_v8  ;;  %v232_v49 = vld [vmem:[%s1343_s23 + $0xc8] sm:$0xff]  ;;  %v250_v51 = vpack.c.bf16 %v230_v45, %v229_v44  ;;  %v243_v52 = vpack.c.bf16 %v216_v47, %v215_v46  ;;  %v217_v54 = vld [vmem:[%s1343_s23 + $0x50] sm:$0xff]  ;;  %v218_v55 = vld [vmem:[%s1343_s23 + $0x58] sm:$0xff] }
  0x55   : > { %817 = vmatprep.subr.bf16.mxu0 %v275_v17  ;;  %862 = vmatprep.subr.bf16.mxu1 %v275_v17  ;;  %v251_v53 = vpack.c.bf16 %v232_v49, %v231_v48  ;;  %v233_v56 = vld [vmem:[%s1343_s23 + $0xd0] sm:$0xff]  ;;  %v234_v57 = vld [vmem:[%s1343_s23 + $0xd8] sm:$0xff]  ;;  %v219_v58 = vld [vmem:[%s1343_s23 + $0x60] sm:$0xff]  ;;  %v244_v62 = vpack.c.bf16 %v218_v55, %v217_v54 }
  0x56   : > { %v220_v59 = vld [vmem:[%s1343_s23 + $0x68] sm:$0xff]  ;;  %v235_v60 = vld [vmem:[%s1343_s23 + $0xe0] sm:$0xff]  ;;  %v252_v63 = vpack.c.bf16 %v234_v57, %v233_v56  ;;  %v221_v2 = vld [vmem:[%s1343_s23 + $0x70] sm:$0xff] }
  0x57   : > { %v236_v61 = vld [vmem:[%s1343_s23 + $0xe8] sm:$0xff]  ;;  %v245_v0 = vpack.c.bf16 %v220_v59, %v219_v58  ;;  %v222_v3 = vld [vmem:[%s1343_s23 + $0x78] sm:$0xff]  ;;  %v237_v4 = vld [vmem:[%s1343_s23 + $0xf0] sm:$0xff] }
  0x58   : > { %818 = vmatpush3.bf16.msra.mxu0 %v275_v17  ;;  %870 = vmatpush3.bf16.msra.mxu1 %v275_v17  ;;  %v253_v1 = vpack.c.bf16 %v236_v61, %v235_v60  ;;  %v238_v5 = vld [vmem:[%s1343_s23 + $0xf8] sm:$0xff]  ;;  %v246_v6 = vpack.c.bf16 %v222_v3, %v221_v2  ;;  %v1388_v8 = vld [vmem:[%s1510_s2] ss:$0 sm:$0xff] }
  0x59   : > { %819 = vmatprep.subr.bf16.mxu0 %v274_v20  ;;  %863 = vmatprep.subr.bf16.mxu1 %v274_v20  ;;  %v254_v7 = vpack.c.bf16 %v238_v5, %v237_v4 }
  0x5c   : > { %820 = vmatpush3.bf16.msra.mxu0 %v274_v20  ;;  %871 = vmatpush3.bf16.msra.mxu1 %v274_v20 }
  0x5d   : > { %821 = vmatprep.subr.bf16.mxu0 %v273_v23  ;;  %864 = vmatprep.subr.bf16.mxu1 %v273_v23 }
  0x60   : > { %822 = vmatpush3.bf16.msra.mxu0 %v273_v23  ;;  %872 = vmatpush3.bf16.msra.mxu1 %v273_v23 }
  0x61   : > { %823 = vmatprep.subr.bf16.mxu0 %v272_v26  ;;  %865 = vmatprep.subr.bf16.mxu1 %v272_v26 }
  0x64   : > { %824 = vmatpush3.bf16.msra.mxu0 %v272_v26  ;;  %873 = vmatpush3.bf16.msra.mxu1 %v272_v26 }
  0x65   : > { %825 = vmatprep.subr.bf16.mxu0 %v271_v29  ;;  %866 = vmatprep.subr.bf16.mxu1 %v271_v29 }
  0x68   : > { %826 = vmatpush3.bf16.msra.mxu0 %v271_v29  ;;  %874 = vmatpush3.bf16.msra.mxu1 %v271_v29 }
  0x6b   : > { %828 = vmatmul.mubr.bf16.vlgmr.msra.gmra.mxu0 %v240_v38  ;;  %844 = vmatmul.mubr.bf16.vlgmr.msra.gmra.mxu1 %v248_v39 }
  0x6c   : > { %831 = vmatprep.mubr.bf16.mxu0 %v241_v40  ;;  %847 = vmatprep.mubr.bf16.mxu1 %v249_v41 }
  0x73   : > { %832 = vmatmul.mubr.bf16.gmra.mxu0 %v242_v50  ;;  %848 = vmatmul.mubr.bf16.gmra.mxu1 %v250_v51 }
  0x74   : > { %835 = vmatprep.mubr.bf16.mxu0 %v243_v52  ;;  %851 = vmatprep.mubr.bf16.mxu1 %v251_v53 }
  0x7b   : > { %836 = vmatmul.mubr.bf16.gmra.mxu0 %v244_v62  ;;  %852 = vmatmul.mubr.bf16.gmra.mxu1 %v252_v63 }
  0x7c   : > { %839 = vmatprep.mubr.bf16.mxu0 %v245_v0  ;;  %855 = vmatprep.mubr.bf16.mxu1 %v253_v1 }
  0x83   : > { %840 = vmatmul.mubr.bf16.gmra.mxu0 %v246_v6  ;;  %856 = vmatmul.mubr.bf16.gmra.mxu1 %v254_v7 }
 0x12b   : > { %v829_v9 = vpop.f32.mrf.mxu0  ;;  %v845_v10 = vpop.f32.mrf.mxu1 }
 0x12c   : > { %v329_v11 = vadd.f32 %v829_v9, %v1388_v8  ;;  %v393_v12 = vadd.f32 %v845_v10, %v1388_v8 }
 0x12d   : > { %v320_v13 = vpop.f32.mrf.mxu0  ;;  %v384_v14 = vpop.f32.mrf.mxu1 }
 0x12e   : > { %v449_v15 = vsub.f32 0.0, %v329_v11  ;;  %v465_v16 = vsub.f32 0.0, %v393_v12  ;;  %v321_v17 = vadd.f32 %v1388_v8, %v320_v13  ;;  %v385_v18 = vadd.f32 %v1388_v8, %v384_v14 }
 0x12f   : > { %v830_v19 = vpop.f32.mrf.mxu0  ;;  %v846_v20 = vpop.f32.mrf.mxu1 }
 0x130   : > { %v483_v21 = vmul.f32 1.442695, %v449_v15  ;;  %v515_v22 = vmul.f32 1.442695, %v465_v16  ;;  %v447_v23 = vsub.f32 0.0, %v321_v17  ;;  %v463_v24 = vsub.f32 0.0, %v385_v18 }
 0x131   : > { %v332_v25 = vadd.f32 %v830_v19, %v1388_v8  ;;  %v396_v26 = vadd.f32 %v846_v20, %v1388_v8  ;;  %v323_v27 = vpop.f32.mrf.mxu0  ;;  %v387_v28 = vpop.f32.mrf.mxu1 }
 0x132   : > { %936 = vpow2.f32 %v483_v21  ;;  %v479_v29 = vmul.f32 1.442695, %v447_v23  ;;  %v511_v30 = vmul.f32 1.442695, %v463_v24  ;;  %v324_v31 = vadd.f32 %v1388_v8, %v323_v27 }
 0x133   : > { %938 = vpow2.f32 %v515_v22  ;;  %v450_v32 = vsub.f32 0.0, %v332_v25  ;;  %v466_v33 = vsub.f32 0.0, %v396_v26  ;;  %v388_v34 = vadd.f32 %v1388_v8, %v387_v28  ;;  %v833_v35 = vpop.f32.mrf.mxu0  ;;  %v849_v36 = vpop.f32.mrf.mxu1 }
 0x134   : > { %940 = vpow2.f32 %v479_v29  ;;  %v448_v37 = vsub.f32 0.0, %v324_v31  ;;  %v345_v38 = vadd.f32 %v833_v35, %v1388_v8  ;;  %v409_v39 = vadd.f32 %v849_v36, %v1388_v8 }
 0x135   : > { %942 = vpow2.f32 %v511_v30  ;;  %v485_v40 = vmul.f32 1.442695, %v450_v32  ;;  %v517_v41 = vmul.f32 1.442695, %v466_v33  ;;  %v464_v42 = vsub.f32 0.0, %v388_v34  ;;  %v336_v43 = vpop.f32.mrf.mxu0  ;;  %v400_v44 = vpop.f32.mrf.mxu1 }
 0x136   : > { %v481_v45 = vmul.f32 1.442695, %v448_v37  ;;  %v453_v46 = vsub.f32 0.0, %v345_v38  ;;  %v469_v47 = vsub.f32 0.0, %v409_v39  ;;  %v337_v48 = vadd.f32 %v1388_v8, %v336_v43 }
 0x137   : > { %944 = vpow2.f32 %v485_v40  ;;  %v513_v49 = vmul.f32 1.442695, %v464_v42  ;;  %v401_v50 = vadd.f32 %v1388_v8, %v400_v44  ;;  %v834_v51 = vpop.f32.mrf.mxu0  ;;  %v850_v52 = vpop.f32.mrf.mxu1 }
 0x138   : > { %946 = vpow2.f32 %v517_v41  ;;  %v491_v53 = vmul.f32 1.442695, %v453_v46  ;;  %v523_v54 = vmul.f32 1.442695, %v469_v47  ;;  %v451_v55 = vsub.f32 0.0, %v337_v48 }
 0x139   : > { %948 = vpow2.f32 %v481_v45  ;;  %v467_v56 = vsub.f32 0.0, %v401_v50  ;;  %v348_v57 = vadd.f32 %v834_v51, %v1388_v8  ;;  %v412_v58 = vadd.f32 %v850_v52, %v1388_v8  ;;  %v339_v59 = vpop.f32.mrf.mxu0  ;;  %v403_v60 = vpop.f32.mrf.mxu1 }
 0x13a   : > { %950 = vpow2.f32 %v513_v49  ;;  %v487_v61 = vmul.f32 1.442695, %v451_v55  ;;  %v340_v62 = vadd.f32 %v1388_v8, %v339_v59  ;;  %v404_v63 = vadd.f32 %v1388_v8, %v403_v60 }
 0x13b   : > { %952 = vpow2.f32 %v491_v53  ;;  %v519_v0 = vmul.f32 1.442695, %v467_v56  ;;  %v454_v1 = vsub.f32 0.0, %v348_v57  ;;  %v470_v2 = vsub.f32 0.0, %v412_v58  ;;  %v837_v3 = vpop.f32.mrf.mxu0  ;;  %v853_v4 = vpop.f32.mrf.mxu1 }
 0x13c   : > { %954 = vpow2.f32 %v523_v54  ;;  %v452_v5 = vsub.f32 0.0, %v340_v62  ;;  %v468_v12 = vsub.f32 0.0, %v404_v63  ;;  %v361_v25 = vadd.f32 %v837_v3, %v1388_v8 }
 0x13d   : > { %956 = vpow2.f32 %v487_v61  ;;  %v493_v6 = vmul.f32 1.442695, %v454_v1  ;;  %v525_v7 = vmul.f32 1.442695, %v470_v2  ;;  %v352_v9 = vpop.f32.mrf.mxu0  ;;  %v416_v10 = vpop.f32.mrf.mxu1  ;;  %v425_v27 = vadd.f32 %v853_v4, %v1388_v8 }
 0x13e   : > { %958 = vpow2.f32 %v519_v0  ;;  %v489_v11 = vmul.f32 1.442695, %v452_v5  ;;  %v521_v22 = vmul.f32 1.442695, %v468_v12  ;;  %v457_v36 = vsub.f32 0.0, %v361_v25 }
 0x13f   : > { %v937_v13 = vpop.eup %936  ;;  %960 = vpow2.f32 %v493_v6  ;;  %v838_v14 = vpop.f32.mrf.mxu0  ;;  %v473_v39 = vsub.f32 0.0, %v425_v27  ;;  %v353_v40 = vadd.f32 %v1388_v8, %v352_v9  ;;  %v417_v43 = vadd.f32 %v1388_v8, %v416_v10 }
 0x140   : > { %v939_v15 = vpop.eup %938  ;;  %v545_v16 = vadd.f32 1.0, %v937_v13  ;;  %962 = vpow2.f32 %v525_v7  ;;  %v854_v19 = vpop.f32.mrf.mxu1  ;;  %v364_v47 = vadd.f32 %v838_v14, %v1388_v8  ;;  %v499_v51 = vmul.f32 1.442695, %v457_v36 }
 0x141   : > { %v941_v17 = vpop.eup %940  ;;  %v561_v18 = vadd.f32 1.0, %v939_v15  ;;  %964 = vpow2.f32 %v489_v11  ;;  %v355_v23 = vpop.f32.mrf.mxu0  ;;  %v428_v52 = vadd.f32 %v854_v19, %v1388_v8  ;;  %v531_v55 = vmul.f32 1.442695, %v473_v39 }
 0x142   : > { %v943_v20 = vpop.eup %942  ;;  %966 = vrcp.f32 %v545_v16  ;;  %v543_v21 = vadd.f32 1.0, %v941_v17  ;;  %v419_v30 = vpop.f32.mrf.mxu1  ;;  %v455_v56 = vsub.f32 0.0, %v353_v40  ;;  %v471_v59 = vsub.f32 0.0, %v417_v43 }
 0x143   : > { %968 = vrcp.f32 %v561_v18  ;;  %v559_v24 = vadd.f32 1.0, %v943_v20  ;;  %v841_v33 = vpop.f32.mrf.mxu0  ;;  %v356_v60 = vadd.f32 %v1388_v8, %v355_v23  ;;  %v458_v0 = vsub.f32 0.0, %v364_v47 }
 0x144   : > { %v945_v26 = vpop.eup %944  ;;  %970 = vrcp.f32 %v543_v21  ;;  %v857_v44 = vpop.f32.mrf.mxu1  ;;  %v420_v1 = vadd.f32 %v1388_v8, %v419_v30  ;;  %v474_v5 = vsub.f32 0.0, %v428_v52  ;;  %v377_v6 = vadd.f32 %v841_v33, %v1388_v8 }
 0x145   : > { %v947_v28 = vpop.eup %946  ;;  %972 = vrcp.f32 %v559_v24  ;;  %v546_v29 = vadd.f32 1.0, %v945_v26  ;;  %v368_v48 = vpop.f32.mrf.mxu0  ;;  %v495_v9 = vmul.f32 1.442695, %v455_v56  ;;  %v441_v10 = vadd.f32 %v857_v44, %v1388_v8 }
 0x146   : > { %v949_v31 = vpop.eup %948  ;;  %v562_v32 = vadd.f32 1.0, %v947_v28  ;;  %974 = vpow2.f32 %v521_v22  ;;  %v432_v61 = vpop.f32.mrf.mxu1  ;;  %v527_v12 = vmul.f32 1.442695, %v471_v59  ;;  %v456_v13 = vsub.f32 0.0, %v356_v60 }
 0x147   : > { %v951_v34 = vpop.eup %950  ;;  %976 = vrcp.f32 %v546_v29  ;;  %v544_v35 = vadd.f32 1.0, %v949_v31  ;;  %v842_v2 = vpop.f32.mrf.mxu0  ;;  %v369_v14 = vadd.f32 %v1388_v8, %v368_v48  ;;  %v501_v17 = vmul.f32 1.442695, %v458_v0 }
 0x148   : > { %v953_v37 = vpop.eup %952  ;;  %978 = vrcp.f32 %v562_v32  ;;  %v560_v38 = vadd.f32 1.0, %v951_v34  ;;  %v858_v15 = vpop.f32.mrf.mxu1  ;;  %v472_v18 = vsub.f32 0.0, %v420_v1  ;;  %v433_v19 = vadd.f32 %v1388_v8, %v432_v61 }
 0x149   : > { %v955_v41 = vpop.eup %954  ;;  %980 = vrcp.f32 %v544_v35  ;;  %v549_v42 = vadd.f32 1.0, %v953_v37  ;;  %v371_v20 = vpop.f32.mrf.mxu0  ;;  %v533_v22 = vmul.f32 1.442695, %v474_v5  ;;  %v461_v23 = vsub.f32 0.0, %v377_v6 }
 0x14a   : > { %v957_v45 = vpop.eup %956  ;;  %982 = vrcp.f32 %v560_v38  ;;  %v565_v46 = vadd.f32 1.0, %v955_v41  ;;  %v380_v24 = vadd.f32 %v842_v2, %v1388_v8  ;;  %v477_v27 = vsub.f32 0.0, %v441_v10  ;;  %v435_v39 = vpop.f32.mrf.mxu1 }
 0x14b   : > { %v959_v49 = vpop.eup %958  ;;  %984 = vrcp.f32 %v549_v42  ;;  %v547_v50 = vadd.f32 1.0, %v957_v45  ;;  %v444_v28 = vadd.f32 %v858_v15, %v1388_v8  ;;  %v497_v30 = vmul.f32 1.442695, %v456_v13 }
 0x14c   : > { %v961_v53 = vpop.eup %960  ;;  %986 = vrcp.f32 %v565_v46  ;;  %v563_v54 = vadd.f32 1.0, %v959_v49  ;;  %v459_v31 = vsub.f32 0.0, %v369_v14  ;;  %v372_v32 = vadd.f32 %v1388_v8, %v371_v20 }
 0x14d   : > { %v963_v57 = vpop.eup %962  ;;  %988 = vrcp.f32 %v547_v50  ;;  %v550_v58 = vadd.f32 1.0, %v961_v53  ;;  %v529_v34 = vmul.f32 1.442695, %v472_v18  ;;  %v475_v35 = vsub.f32 0.0, %v433_v19 }
 0x14e   : > { %v965_v62 = vpop.eup %964  ;;  %990 = vrcp.f32 %v563_v54  ;;  %v566_v63 = vadd.f32 1.0, %v963_v57  ;;  %v507_v37 = vmul.f32 1.442695, %v461_v23  ;;  %v462_v38 = vsub.f32 0.0, %v380_v24 }
 0x14f   : > { %v967_v3 = vpop.eup %966  ;;  %992 = vrcp.f32 %v550_v58  ;;  %v548_v4 = vadd.f32 1.0, %v965_v62  ;;  %v539_v41 = vmul.f32 1.442695, %v477_v27  ;;  %v478_v42 = vsub.f32 0.0, %v444_v28 }
 0x150   : > { %v969_v7 = vpop.eup %968  ;;  %641 = vst [vmem:[%s1417_s28 + $0x10] sm:$0xff] %v967_v3  ;;  %994 = vrcp.f32 %v566_v63  ;;  %v503_v44 = vmul.f32 1.442695, %v459_v31  ;;  %v460_v45 = vsub.f32 0.0, %v372_v32  ;;  %v535_v47 = vmul.f32 1.442695, %v475_v35 }
 0x151   : > { %v971_v11 = vpop.eup %970  ;;  %657 = vst [vmem:[%s1417_s28 + $0x90] sm:$0xff] %v969_v7  ;;  %996 = vrcp.f32 %v548_v4  ;;  %v436_v48 = vadd.f32 %v1388_v8, %v435_v39  ;;  %v509_v50 = vmul.f32 1.442695, %v462_v38  ;;  %v541_v52 = vmul.f32 1.442695, %v478_v42 }
 0x152   : > { %v973_v16 = vpop.eup %972  ;;  %639 = vst [vmem:[%s1417_s28] sm:$0xff] %v971_v11  ;;  %998 = vpow2.f32 %v499_v51  ;;  %v505_v54 = vmul.f32 1.442695, %v460_v45 }
 0x153   : > { %v975_v21 = vpop.eup %974  ;;  %655 = vst [vmem:[%s1417_s28 + $0x80] sm:$0xff] %v973_v16  ;;  %1000 = vpow2.f32 %v531_v55  ;;  %v476_v56 = vsub.f32 0.0, %v436_v48 }
 0x154   : > { %v977_v25 = vpop.eup %976  ;;  %v564_v26 = vadd.f32 1.0, %v975_v21  ;;  %1002 = vpow2.f32 %v495_v9 }
 0x155   : > { %v979_v29 = vpop.eup %978  ;;  %642 = vst [vmem:[%s1417_s28 + $0x18] sm:$0xff] %v977_v25  ;;  %1004 = vpow2.f32 %v527_v12  ;;  %v537_v63 = vmul.f32 1.442695, %v476_v56 }
 0x156   : > { %v981_v33 = vpop.eup %980  ;;  %658 = vst [vmem:[%s1417_s28 + $0x98] sm:$0xff] %v979_v29  ;;  %1006 = vrcp.f32 %v564_v26 }
 0x157   : > { %v983_v36 = vpop.eup %982  ;;  %640 = vst [vmem:[%s1417_s28 + $0x8] sm:$0xff] %v981_v33  ;;  %1008 = vpow2.f32 %v501_v17 }
 0x158   : > { %v985_v40 = vpop.eup %984  ;;  %656 = vst [vmem:[%s1417_s28 + $0x88] sm:$0xff] %v983_v36  ;;  %1010 = vpow2.f32 %v533_v22 }
 0x159   : > { %v987_v43 = vpop.eup %986  ;;  %645 = vst [vmem:[%s1417_s28 + $0x30] sm:$0xff] %v985_v40  ;;  %1012 = vpow2.f32 %v497_v30 }
 0x15a   : > { %v989_v46 = vpop.eup %988  ;;  %661 = vst [vmem:[%s1417_s28 + $0xb0] sm:$0xff] %v987_v43  ;;  %1014 = vpow2.f32 %v529_v34 }
 0x15b   : > { %v991_v49 = vpop.eup %990  ;;  %643 = vst [vmem:[%s1417_s28 + $0x20] sm:$0xff] %v989_v46  ;;  %1016 = vpow2.f32 %v507_v37 }
 0x15c   : > { %v993_v51 = vpop.eup %992  ;;  %659 = vst [vmem:[%s1417_s28 + $0xa0] sm:$0xff] %v991_v49  ;;  %1018 = vpow2.f32 %v539_v41 }
 0x15d   : > { %v995_v53 = vpop.eup %994  ;;  %646 = vst [vmem:[%s1417_s28 + $0x38] sm:$0xff] %v993_v51  ;;  %1020 = vpow2.f32 %v503_v44 }
 0x15e   : > { %v997_v55 = vpop.eup %996  ;;  %662 = vst [vmem:[%s1417_s28 + $0xb8] sm:$0xff] %v995_v53  ;;  %1022 = vpow2.f32 %v535_v47 }
 0x15f   : > { %v999_v57 = vpop.eup %998  ;;  %644 = vst [vmem:[%s1417_s28 + $0x28] sm:$0xff] %v997_v55  ;;  %1024 = vpow2.f32 %v509_v50 }
 0x160   : > { %v1001_v8 = vpop.eup %1000  ;;  %v553_v58 = vadd.f32 1.0, %v999_v57  ;;  %1026 = vpow2.f32 %v541_v52 }
 0x161   : > { %v1003_v59 = vpop.eup %1002  ;;  %v569_v60 = vadd.f32 1.0, %v1001_v8  ;;  %1028 = vpow2.f32 %v505_v54 }
 0x162   : > { %v1005_v61 = vpop.eup %1004  ;;  %1030 = vrcp.f32 %v553_v58  ;;  %v551_v62 = vadd.f32 1.0, %v1003_v59 }
 0x163   : > { %v1007_v0 = vpop.eup %1006  ;;  %1032 = vrcp.f32 %v569_v60  ;;  %v567_v1 = vadd.f32 1.0, %v1005_v61 }
 0x164   : > { %v1009_v2 = vpop.eup %1008  ;;  %660 = vst [vmem:[%s1417_s28 + $0xa8] sm:$0xff] %v1007_v0  ;;  %1034 = vrcp.f32 %v551_v62 }
 0x165   : > { %v1011_v3 = vpop.eup %1010  ;;  %1036 = vrcp.f32 %v567_v1  ;;  %v554_v4 = vadd.f32 1.0, %v1009_v2 }
 0x166   : > { %v1013_v5 = vpop.eup %1012  ;;  %v570_v6 = vadd.f32 1.0, %v1011_v3  ;;  %1038 = vpow2.f32 %v537_v63 }
 0x167   : > { %v1015_v7 = vpop.eup %1014  ;;  %1040 = vrcp.f32 %v554_v4  ;;  %v552_v9 = vadd.f32 1.0, %v1013_v5 }
 0x168   : > { %v1017_v10 = vpop.eup %1016  ;;  %1042 = vrcp.f32 %v570_v6  ;;  %v568_v11 = vadd.f32 1.0, %v1015_v7 }
 0x169   : > { %v1019_v12 = vpop.eup %1018  ;;  %1044 = vrcp.f32 %v552_v9  ;;  %v557_v13 = vadd.f32 1.0, %v1017_v10 }
 0x16a   : > { %v1021_v14 = vpop.eup %1020  ;;  %1046 = vrcp.f32 %v568_v11  ;;  %v573_v15 = vadd.f32 1.0, %v1019_v12 }
 0x16b   : > { %v1023_v16 = vpop.eup %1022  ;;  %1048 = vrcp.f32 %v557_v13  ;;  %v555_v17 = vadd.f32 1.0, %v1021_v14 }
 0x16c   : > { %v1025_v18 = vpop.eup %1024  ;;  %1050 = vrcp.f32 %v573_v15  ;;  %v571_v19 = vadd.f32 1.0, %v1023_v16 }
 0x16d   : > { %v1027_v20 = vpop.eup %1026  ;;  %1052 = vrcp.f32 %v555_v17  ;;  %v558_v21 = vadd.f32 1.0, %v1025_v18 }
 0x16e   : > { %v1029_v22 = vpop.eup %1028  ;;  %1054 = vrcp.f32 %v571_v19  ;;  %v574_v23 = vadd.f32 1.0, %v1027_v20 }
 0x16f   : > { %v1031_v24 = vpop.eup %1030  ;;  %1056 = vrcp.f32 %v558_v21  ;;  %v556_v25 = vadd.f32 1.0, %v1029_v22 }
 0x170   : > { %v1033_v26 = vpop.eup %1032  ;;  %649 = vst [vmem:[%s1417_s28 + $0x50] sm:$0xff] %v1031_v24  ;;  %1058 = vrcp.f32 %v574_v23 }
 0x171   : > { %v1035_v27 = vpop.eup %1034  ;;  %665 = vst [vmem:[%s1417_s28 + $0xd0] sm:$0xff] %v1033_v26  ;;  %1060 = vrcp.f32 %v556_v25 }
 0x172   : > { %v1037_v28 = vpop.eup %1036  ;;  %647 = vst [vmem:[%s1417_s28 + $0x40] sm:$0xff] %v1035_v27 }
 0x173   : > { %v1039_v29 = vpop.eup %1038  ;;  %663 = vst [vmem:[%s1417_s28 + $0xc0] sm:$0xff] %v1037_v28 }
 0x174   : > { %v1041_v30 = vpop.eup %1040  ;;  %v572_v31 = vadd.f32 1.0, %v1039_v29 }
 0x175   : > { %v1043_v32 = vpop.eup %1042  ;;  %650 = vst [vmem:[%s1417_s28 + $0x58] sm:$0xff] %v1041_v30 }
 0x176   : > { %v1045_v33 = vpop.eup %1044  ;;  %666 = vst [vmem:[%s1417_s28 + $0xd8] sm:$0xff] %v1043_v32  ;;  %1062 = vrcp.f32 %v572_v31 }
 0x177   : > { %v1047_v34 = vpop.eup %1046  ;;  %648 = vst [vmem:[%s1417_s28 + $0x48] sm:$0xff] %v1045_v33 }
 0x178   : > { %v1049_v35 = vpop.eup %1048  ;;  %664 = vst [vmem:[%s1417_s28 + $0xc8] sm:$0xff] %v1047_v34 }
 0x179   : > { %v1051_v36 = vpop.eup %1050  ;;  %653 = vst [vmem:[%s1417_s28 + $0x70] sm:$0xff] %v1049_v35 }
 0x17a   : > { %v1053_v37 = vpop.eup %1052  ;;  %669 = vst [vmem:[%s1417_s28 + $0xf0] sm:$0xff] %v1051_v36 }
 0x17b   : > { %v1055_v38 = vpop.eup %1054  ;;  %651 = vst [vmem:[%s1417_s28 + $0x60] sm:$0xff] %v1053_v37 }
 0x17c   : > { %v1057_v39 = vpop.eup %1056  ;;  %667 = vst [vmem:[%s1417_s28 + $0xe0] sm:$0xff] %v1055_v38 }
 0x17d   : > { %v1059_v40 = vpop.eup %1058  ;;  %654 = vst [vmem:[%s1417_s28 + $0x78] sm:$0xff] %v1057_v39 }
 0x17e   : > { %v1061_v41 = vpop.eup %1060  ;;  %670 = vst [vmem:[%s1417_s28 + $0xf8] sm:$0xff] %v1059_v40 }
 0x17f   : > { %652 = vst [vmem:[%s1417_s28 + $0x68] sm:$0xff] %v1061_v41 }
 0x183   : > { %v1063_v42 = vpop.eup %1062 }
 0x184   : > { %668 = vst [vmem:[%s1417_s28 + $0xe8] sm:$0xff] %v1063_v42 }
 0x185   : > { %1131 = shalt.err (!%p1128_p0)
}
 0x186   : > { %s1132_s11 = scalar_lea.hbm %s1462_s4, 4096  ;;  %s1136_s30 = scalar_lea.hbm %s1511_s3, 8192 }
 0x187   : > { %p1133_p5 = scmp.ne.s32.totalorder %s1462_s4, %s1132_s11  ;;  %p1137_p4 = scmp.lt.s32.totalorder %s1462_s4, %s1511_s3 }
 0x188   : > { %p1138_p6 = scmp.lt.s32.totalorder %s1136_s30, %s1132_s11 }
 0x189   : > { %p1134_p2 = pnand %p1133_p5, %p1527_p11 }
 0x18a   : > { %p1139_p8 = por %p1138_p6, %p1137_p4 }
 0x18b   : > { %p1135_p1 = pneg %p1134_p2 }
 0x18d   : > { %p1140_p3 = pnand %p1139_p8, %p1135_p1 }
 0x18f   : > { %1143 = shalt.err (!%p1140_p3)
}
 0x190   : > { %s1193_s20 = smov 128   ;;  %s1194_s28 = smov 8  }
 0x191   : > { %881 = dma.vmem_to_hbm [thread:$0]  (%p1527_p11), %s1464_s17, 4096, %s1462_s4, %s672_s8, %s1193_s20, %s1193_s20, %s1194_s28  }
 0x192 PF: > { %s700_s29 = sand.u32 1, %s1174_s12   ;;  %p1528_p7 = scmp.ne.s32.totalorder %s1517_s19, 0 }
 0x193   : > { %p1529_p9 = scmp.ge.s32.totalorder %s1186_s15, 2  ;;  %s701_s22 = scalar_lea.sflag [#allocation4], %s700_s29 }
 0x195   : > { %p892_p10 = pnand %p1529_p9, %p1528_p7 }
 0x197   : > { %p893_p12 = pneg %p892_p10 }
 0x199   : > { %1169 = dma.done.wait (%p893_p12), %s701_s22, 4096  }
 0x19a   : > { %1171 = vsyncadd (%p893_p12), %s701_s22, 4294963200  ;;  %p17_p13 = scmp.ge.s32.totalorder %s1269_s24, 4   ;;  %s1530_s12 = smov %s1178_s13 }
 0x19b   : > { %s1531_s13 = smov %s1182_s14  ;;  %s1532_s14 = smov %s1289_s5 }
 0x19c   : > { %s1533_s15 = smov %s1269_s24  ;;  %19 = sbr.rel (!%p17_p13) target bundleno = 6 (0x6), region = 81 }
 0x1a1   :  { %706 = vsyncpa [#allocation3], 1 }
 0x1a2   :  { %708 = vsyncpa [#allocation3 + $0x1], 1 }
 0x1a3   :  { %709 = vsyncpa [#allocation6], 1 }
 0x1a4   :  { %710 = vsyncpa [#allocation4], 1 }
 0x1a5   :  { %712 = vsyncpa [#allocation4 + $0x1], 1 }

</bundles_post_ra>
